<compile_context>
chip_gen: v7x
topology: tpu7x:2x2x1
jax: 0.10.0
libtpu: 0.0.40
codegen_flags: <defaults>
</compile_context>

<pallas_src>
import functools
import math

import jax
import jax.numpy as jnp
from jax.experimental import pallas as pl
from jax.experimental.pallas import tpu as pltpu

_BN_EPS = 1e-5
_LRELU_SLOPE = 0.2


# ----------------------------------------------------------------------------
# Fused kernel: Conv1d (single deep matmul) -> BN(batch stats) -> LeakyReLU
# ----------------------------------------------------------------------------
def _make_kernel(n_batch, nb, cin, cout, lout, k, s):
    mb = nb * lout                       # output columns per batch block
    inv_m = 1.0 / float(n_batch * lout)  # 1 / (#samples per channel)

    def kernel(x_ref, w_ref, g_ref, bt_ref, o_ref,
               patch_ref, sum_ref, ssq_ref, scale_ref, shift_ref):
        # x_ref  : (s, Cin, NB, Lphase)      bf16  (phase-split batch block)
        # w_ref  : (Cout, K*Cin)             bf16  (taps folded into contraction)
        # g_ref, bt_ref : (Cout, 1)          f32
        # o_ref  : (nblocks, Cout, NB*Lout)  f32   (whole output, VMEM resident)
        ph = pl.program_id(0)   # 0: conv + stats pass, 1: normalize pass
        bi = pl.program_id(1)   # batch-block index

        @pl.when(jnp.logical_and(ph == 0, bi == 0))
        def _init():
            sum_ref[...] = jnp.zeros_like(sum_ref)
            ssq_ref[...] = jnp.zeros_like(ssq_ref)

        @pl.when(ph == 0)
        def _conv_and_stats():
            # In-kernel im2col: one copy of the K overlapping taps into a
            # (K*Cin, NB*Lout) patch (all indices static), then ONE deep matmul.
            for t in range(k):
                for j in range(nb):
                    patch_ref[t * cin:(t + 1) * cin,
                              j * lout:(j + 1) * lout] = (
                        x_ref[t % s, :, j, t // s: t // s + lout])
            y = jnp.dot(w_ref[...], patch_ref[...],
                        preferred_element_type=jnp.float32)   # (Cout, NB*Lout)
            # NOTE: no conv-bias add -- batch-stat BN cancels it exactly.
            # Cache the unnormalized conv in the resident output buffer; the
            # normalize pass re-reads it instead of recomputing the conv.
            o_ref[bi, :, :] = y
            sum_ref[...] += jnp.sum(y, axis=1, keepdims=True)
            ssq_ref[...] += jnp.sum(y * y, axis=1, keepdims=True)

        @pl.when(jnp.logical_and(ph == 1, bi == 0))
        def _finalize_stats():
            mean = sum_ref[...] * inv_m
            # biased variance (PyTorch BN), clamped against f32 cancellation
            var = jnp.maximum(ssq_ref[...] * inv_m - mean * mean, 0.0)
            sc = g_ref[...] * jax.lax.rsqrt(var + _BN_EPS)
            scale_ref[...] = sc
            shift_ref[...] = bt_ref[...] - mean * sc          # folded BN affine

        @pl.when(ph == 1)
        def _normalize():
            z = o_ref[bi, :, :] * scale_ref[...] + shift_ref[...]
            o_ref[bi, :, :] = jnp.maximum(z, _LRELU_SLOPE * z)  # LeakyReLU(0.2)

    return kernel


def _pick_batch_block(n, lout):
    """Samples per grid step: whole batch when small, else a multiple of 8
    (sublane tiling constraint on the x block) dividing N that gives >=~512
    output lanes per step."""
    if n * lout <= 512 or n <= 8:
        return n
    target = max(1, -(-512 // lout))
    best = n
    for nb in range(8, n + 1, 8):
        if n % nb == 0:
            best = nb
            if nb >= target:
                break
    return best


# ----------------------------------------------------------------------------
# Wrapper: ConvNormRelu1d forward.  x: (N, Cin, L) f32 -> (N, Cout, Lout) f32
# ----------------------------------------------------------------------------
def conv_norm_relu_1d(x, w, b, gamma, beta, *, k, s, p):
    del b  # conv bias is mathematically cancelled by batch-stat BatchNorm
    n, cin, length = x.shape
    cout = w.shape[0]
    lpad = length + 2 * p
    lout = (lpad - k) // s + 1
    lphase = -(-lpad // s)               # ceil(lpad / s)

    nb = _pick_batch_block(n, lout)
    nblocks = n // nb
    mb = nb * lout

    # Pad once; phase-split the length axis so every tap is a contiguous slice.
    # Layout (s, Cin, N, Lphase): one tap slice covers a whole batch block.
    xp = jnp.pad(x, ((0, 0), (0, 0), (p, p + lphase * s - lpad)))
    xs = (xp.reshape(n, cin, lphase, s)
            .transpose(3, 1, 0, 2)
            .astype(jnp.bfloat16))                              # bf16 MXU operand
    # w: (Cout, Cin, K) -> (Cout, K*Cin) with contraction index t*Cin + c
    wt = jnp.transpose(w, (0, 2, 1)).reshape(cout, k * cin).astype(jnp.bfloat16)

    kernel = _make_kernel(n, nb, cin, cout, lout, k, s)
    flops = 2 * cout * (k * cin) * (n * lout) + 6 * cout * n * lout
    bytes_accessed = xs.size * 2 + wt.size * 2 + 2 * cout * 4 + n * cout * lout * 4

    out = pl.pallas_call(
        kernel,
        out_shape=jax.ShapeDtypeStruct((nblocks, cout, mb), jnp.float32),
        grid_spec=pltpu.PrefetchScalarGridSpec(
            num_scalar_prefetch=0,
            grid=(2, nblocks),               # (pass, batch block) -- sequential
            in_specs=[
                # x: one block per batch block in pass 0; the index collapses
                # to block 0 in pass 1 so x is not streamed twice.
                pl.BlockSpec((s, cin, nb, lphase),
                             lambda ph, bi: (0, 0, bi * (1 - ph), 0)),
                pl.BlockSpec((cout, k * cin), lambda ph, bi: (0, 0)),
                pl.BlockSpec((cout, 1), lambda ph, bi: (0, 0)),
                pl.BlockSpec((cout, 1), lambda ph, bi: (0, 0)),
            ],
            # Whole output resident in VMEM (constant block index): it doubles
            # as the unnormalized-conv cache between the two passes and is
            # written back to HBM exactly once, lane-dense (last dim = NB*Lout).
            out_specs=pl.BlockSpec((nblocks, cout, mb), lambda ph, bi: (0, 0, 0)),
            scratch_shapes=[
                pltpu.VMEM((k * cin, mb), jnp.bfloat16),   # im2col patch
                pltpu.VMEM((cout, 1), jnp.float32),        # sum
                pltpu.VMEM((cout, 1), jnp.float32),        # sum of squares
                pltpu.VMEM((cout, 1), jnp.float32),        # folded BN scale
                pltpu.VMEM((cout, 1), jnp.float32),        # folded BN shift
            ]),
        compiler_params=pltpu.CompilerParams(
            dimension_semantics=("arbitrary", "arbitrary")),
        cost_estimate=pl.CostEstimate(flops=int(flops), transcendentals=int(cout),
                                      bytes_accessed=int(bytes_accessed)),
    )(xs, wt, gamma.reshape(cout, 1), beta.reshape(cout, 1))

    # (nblocks, Cout, NB*Lout) -> (N, Cout, Lout)
    # TODO(synk): when chained with the next ConvNormRelu1d layer, emit bf16 and
    #             keep the fused layout to skip this glue + the f32 round trip.
    return (out.reshape(nblocks, cout, nb, lout)
               .transpose(0, 2, 1, 3)
               .reshape(n, cout, lout))


# ----------------------------------------------------------------------------
# Pure-JAX reference (f32) for correctness checking.
# ----------------------------------------------------------------------------
def _ref_conv_norm_relu_1d(x, w, b, gamma, beta, *, k, s, p):
    y = jax.lax.conv_general_dilated(
        x, w, window_strides=(s,), padding=[(p, p)],
        dimension_numbers=("NCH", "OIH", "NCH"))
    y = y + b[None, :, None]
    mean = jnp.mean(y, axis=(0, 2), keepdims=True)
    var = jnp.mean(jnp.square(y - mean), axis=(0, 2), keepdims=True)
    yh = (y - mean) * jax.lax.rsqrt(var + _BN_EPS)
    yh = yh * gamma[None, :, None] + beta[None, :, None]
    return jnp.where(yh >= 0, yh, _LRELU_SLOPE * yh)


# ----------------------------------------------------------------------------
# Deterministic init matching weights_init: xavier_uniform conv weight, zero
# bias, BN gamma=1 / beta=0.
# ----------------------------------------------------------------------------
def _init_conv_bn(key, cin, cout, k):
    bound = math.sqrt(6.0 / (cin * k + cout * k))
    w = jax.random.uniform(key, (cout, cin, k), jnp.float32, -bound, bound)
    b = jnp.zeros((cout,), jnp.float32)
    gamma = jnp.ones((cout,), jnp.float32)
    beta = jnp.zeros((cout,), jnp.float32)
    return w, b, gamma, beta


if __name__ == "__main__":
    key = jax.random.PRNGKey(0)
    kx, kw1, kw2 = jax.random.split(key, 3)

    batch, cin, cout, length = 2, 4, 32, 16
    x = jax.random.normal(kx, (batch, cin, length), jnp.float32)

    # Two flavors used by the surrounding UNet: DoubleConv (k=3,s=1,p=1) and
    # Down (k=4,s=2,p=1).
    for (k, s, p, kw) in [(3, 1, 1, kw1), (4, 2, 1, kw2)]:
        w, b, gamma, beta = _init_conv_bn(kw, cin, cout, k)
        fwd = jax.jit(functools.partial(conv_norm_relu_1d, k=k, s=s, p=p))
        out = jax.block_until_ready(fwd(x, w, b, gamma, beta))

        lout = (length + 2 * p - k) // s + 1
        assert out.shape == (batch, cout, lout), out.shape
        assert bool(jnp.all(jnp.isfinite(out)))
        ref = _ref_conv_norm_relu_1d(x, w, b, gamma, beta, k=k, s=s, p=p)
        max_err = float(jnp.max(jnp.abs(out - ref)))
        assert max_err < 5e-2, (k, s, p, max_err)

    print("KERNEL_OK")
</pallas_src>

<mosaic_0001>
module attributes {stable_mosaic.version = 11 : i64} {
  func.func @kernel(%arg0: i32, %arg1: i32, %arg2: memref<1x4x2x18xbf16, #tpu.memory_space<vmem>>, %arg3: memref<32x12xbf16, #tpu.memory_space<vmem>>, %arg4: memref<32x1xf32, #tpu.memory_space<vmem>>, %arg5: memref<32x1xf32, #tpu.memory_space<vmem>>, %arg6: memref<1x32x32xf32, #tpu.memory_space<vmem>>, %arg7: memref<12x32xbf16, #tpu.memory_space<vmem>>, %arg8: memref<32x1xf32, #tpu.memory_space<vmem>>, %arg9: memref<32x1xf32, #tpu.memory_space<vmem>>, %arg10: memref<32x1xf32, #tpu.memory_space<vmem>>, %arg11: memref<32x1xf32, #tpu.memory_space<vmem>>) attributes {dimension_semantics = [#tpu.dimension_semantics<arbitrary>, #tpu.dimension_semantics<arbitrary>], iteration_bounds = array<i64: 2, 1>, scalar_prefetch = 0 : i64, scratch_operands = 5 : i64, tpu.core_type = #tpu.core_type<tc>, window_params = [{transform_indices = @transform_0, window_bounds = array<i64: 1, 4, 2, 18>}, {pipeline_mode = #tpu.pipeline_mode<synchronous>, transform_indices = @transform_1, window_bounds = array<i64: 32, 12>}, {pipeline_mode = #tpu.pipeline_mode<synchronous>, transform_indices = @transform_2, window_bounds = array<i64: 32, 1>}, {pipeline_mode = #tpu.pipeline_mode<synchronous>, transform_indices = @transform_3, window_bounds = array<i64: 32, 1>}, {pipeline_mode = #tpu.pipeline_mode<synchronous>, transform_indices = @transform_4, window_bounds = array<i64: 1, 32, 32>}]} {
    %c0_i32 = arith.constant 0 : i32
    %0 = arith.cmpi eq, %arg0, %c0_i32 : i32
    %c0_i32_0 = arith.constant 0 : i32
    %1 = arith.cmpi eq, %arg1, %c0_i32_0 : i32
    %2 = arith.andi %0, %1 : i1
    %3 = arith.extui %2 : i1 to i32
    %c0_i32_1 = arith.constant 0 : i32
    %4 = arith.cmpi ne, %3, %c0_i32_1 : i32
    scf.if %4 {
      %cst = arith.constant 0.000000e+00 : f32
      %16 = vector.broadcast %cst : f32 to vector<32x1xf32>
      %c0 = arith.constant 0 : index
      %c0_8 = arith.constant 0 : index
      %17 = vector.load %arg8[%c0, %c0_8] : memref<32x1xf32, #tpu.memory_space<vmem>>, vector<32x1xf32>
      tpu.vector_store %arg8[%c0, %c0_8], %16 {strides = array<i32>} : memref<32x1xf32, #tpu.memory_space<vmem>>, vector<32x1xf32>,
      %cst_9 = arith.constant 0.000000e+00 : f32
      %18 = vector.broadcast %cst_9 : f32 to vector<32x1xf32>
      %c0_10 = arith.constant 0 : index
      %c0_11 = arith.constant 0 : index
      %19 = vector.load %arg9[%c0_10, %c0_11] : memref<32x1xf32, #tpu.memory_space<vmem>>, vector<32x1xf32>
      tpu.vector_store %arg9[%c0_10, %c0_11], %18 {strides = array<i32>} : memref<32x1xf32, #tpu.memory_space<vmem>>, vector<32x1xf32>,
    } else {
    }
    %c0_i32_2 = arith.constant 0 : i32
    %5 = arith.cmpi eq, %arg0, %c0_i32_2 : i32
    %6 = arith.extui %5 : i1 to i32
    %c0_i32_3 = arith.constant 0 : i32
    %7 = arith.cmpi ne, %6, %c0_i32_3 : i32
    scf.if %7 {
      %c0 = arith.constant 0 : index
      %c0_8 = arith.constant 0 : index
      %c0_9 = arith.constant 0 : index
      %c0_10 = arith.constant 0 : index
      %16 = vector.load %arg2[%c0, %c0_8, %c0_9, %c0_10] : memref<1x4x2x18xbf16, #tpu.memory_space<vmem>>, vector<1x4x1x16xbf16>
      %17 = vector.shape_cast %16 : vector<1x4x1x16xbf16> to vector<4x16xbf16>
      %c0_11 = arith.constant 0 : index
      %c0_12 = arith.constant 0 : index
      %18 = vector.load %arg7[%c0_11, %c0_12] : memref<12x32xbf16, #tpu.memory_space<vmem>>, vector<4x16xbf16>
      tpu.vector_store %arg7[%c0_11, %c0_12], %17 {strides = array<i32>} : memref<12x32xbf16, #tpu.memory_space<vmem>>, vector<4x16xbf16>,
      %c0_13 = arith.constant 0 : index
      %c0_14 = arith.constant 0 : index
      %c1 = arith.constant 1 : index
      %c0_15 = arith.constant 0 : index
      %19 = vector.load %arg2[%c0_13, %c0_14, %c1, %c0_15] : memref<1x4x2x18xbf16, #tpu.memory_space<vmem>>, vector<1x4x1x16xbf16>
      %20 = vector.shape_cast %19 : vector<1x4x1x16xbf16> to vector<4x16xbf16>
      %c0_16 = arith.constant 0 : index
      %c16 = arith.constant 16 : index
      %21 = vector.load %arg7[%c0_16, %c16] : memref<12x32xbf16, #tpu.memory_space<vmem>>, vector<4x16xbf16>
      tpu.vector_store %arg7[%c0_16, %c16], %20 {strides = array<i32>} : memref<12x32xbf16, #tpu.memory_space<vmem>>, vector<4x16xbf16>,
      %c0_17 = arith.constant 0 : index
      %c0_18 = arith.constant 0 : index
      %c0_19 = arith.constant 0 : index
      %c1_20 = arith.constant 1 : index
      %22 = vector.load %arg2[%c0_17, %c0_18, %c0_19, %c1_20] : memref<1x4x2x18xbf16, #tpu.memory_space<vmem>>, vector<1x4x1x16xbf16>
      %23 = vector.shape_cast %22 : vector<1x4x1x16xbf16> to vector<4x16xbf16>
      %c4 = arith.constant 4 : index
      %c0_21 = arith.constant 0 : index
      %24 = vector.load %arg7[%c4, %c0_21] : memref<12x32xbf16, #tpu.memory_space<vmem>>, vector<4x16xbf16>
      tpu.vector_store %arg7[%c4, %c0_21], %23 {strides = array<i32>} : memref<12x32xbf16, #tpu.memory_space<vmem>>, vector<4x16xbf16>,
      %c0_22 = arith.constant 0 : index
      %c0_23 = arith.constant 0 : index
      %c1_24 = arith.constant 1 : index
      %c1_25 = arith.constant 1 : index
      %25 = vector.load %arg2[%c0_22, %c0_23, %c1_24, %c1_25] : memref<1x4x2x18xbf16, #tpu.memory_space<vmem>>, vector<1x4x1x16xbf16>
      %26 = vector.shape_cast %25 : vector<1x4x1x16xbf16> to vector<4x16xbf16>
      %c4_26 = arith.constant 4 : index
      %c16_27 = arith.constant 16 : index
      %27 = vector.load %arg7[%c4_26, %c16_27] : memref<12x32xbf16, #tpu.memory_space<vmem>>, vector<4x16xbf16>
      tpu.vector_store %arg7[%c4_26, %c16_27], %26 {strides = array<i32>} : memref<12x32xbf16, #tpu.memory_space<vmem>>, vector<4x16xbf16>,
      %c0_28 = arith.constant 0 : index
      %c0_29 = arith.constant 0 : index
      %c0_30 = arith.constant 0 : index
      %c2 = arith.constant 2 : index
      %28 = vector.load %arg2[%c0_28, %c0_29, %c0_30, %c2] : memref<1x4x2x18xbf16, #tpu.memory_space<vmem>>, vector<1x4x1x16xbf16>
      %29 = vector.shape_cast %28 : vector<1x4x1x16xbf16> to vector<4x16xbf16>
      %c8 = arith.constant 8 : index
      %c0_31 = arith.constant 0 : index
      %30 = vector.load %arg7[%c8, %c0_31] : memref<12x32xbf16, #tpu.memory_space<vmem>>, vector<4x16xbf16>
      tpu.vector_store %arg7[%c8, %c0_31], %29 {strides = array<i32>} : memref<12x32xbf16, #tpu.memory_space<vmem>>, vector<4x16xbf16>,
      %c0_32 = arith.constant 0 : index
      %c0_33 = arith.constant 0 : index
      %c1_34 = arith.constant 1 : index
      %c2_35 = arith.constant 2 : index
      %31 = vector.load %arg2[%c0_32, %c0_33, %c1_34, %c2_35] : memref<1x4x2x18xbf16, #tpu.memory_space<vmem>>, vector<1x4x1x16xbf16>
      %32 = vector.shape_cast %31 : vector<1x4x1x16xbf16> to vector<4x16xbf16>
      %c8_36 = arith.constant 8 : index
      %c16_37 = arith.constant 16 : index
      %33 = vector.load %arg7[%c8_36, %c16_37] : memref<12x32xbf16, #tpu.memory_space<vmem>>, vector<4x16xbf16>
      tpu.vector_store %arg7[%c8_36, %c16_37], %32 {strides = array<i32>} : memref<12x32xbf16, #tpu.memory_space<vmem>>, vector<4x16xbf16>,
      %c0_38 = arith.constant 0 : index
      %c0_39 = arith.constant 0 : index
      %34 = vector.load %arg3[%c0_38, %c0_39] : memref<32x12xbf16, #tpu.memory_space<vmem>>, vector<32x12xbf16>
      %c0_40 = arith.constant 0 : index
      %c0_41 = arith.constant 0 : index
      %35 = vector.load %arg7[%c0_40, %c0_41] : memref<12x32xbf16, #tpu.memory_space<vmem>>, vector<12x32xbf16>
      %cst = arith.constant dense<0.000000e+00> : vector<32x32xf32>
      %36 = tpu.matmul %34, %35, %cst {dimension_numbers = #tpu.dot_dimension_numbers<[1], [0], [0], [1], [0, 0, 1, 1], [], []>} : vector<32x12xbf16>, vector<12x32xbf16>, vector<32x32xf32> -> vector<32x32xf32>
      %37 = arith.index_cast %arg1 : i32 to index
      %c0_42 = arith.constant 0 : index
      %c0_43 = arith.constant 0 : index
      %38 = vector.load %arg6[%37, %c0_42, %c0_43] : memref<1x32x32xf32, #tpu.memory_space<vmem>>, vector<1x32x32xf32>
      %39 = vector.shape_cast %38 : vector<1x32x32xf32> to vector<32x32xf32>
      %40 = vector.shape_cast %36 : vector<32x32xf32> to vector<1x32x32xf32>
      tpu.vector_store %arg6[%37, %c0_42, %c0_43], %40 {strides = array<i32>} : memref<1x32x32xf32, #tpu.memory_space<vmem>>, vector<1x32x32xf32>,
      %c0_44 = arith.constant 0 : index
      %c0_45 = arith.constant 0 : index
      %41 = vector.load %arg8[%c0_44, %c0_45] : memref<32x1xf32, #tpu.memory_space<vmem>>, vector<32x1xf32>
      %cst_46 = arith.constant dense<0.000000e+00> : vector<32xf32>
      %42 = vector.multi_reduction <add>, %36, %cst_46 [1] : vector<32x32xf32> to vector<32xf32>
      %43 = vector.shape_cast %42 : vector<32xf32> to vector<32x1xf32>
      %44 = arith.addf %41, %43 : vector<32x1xf32>
      %c0_47 = arith.constant 0 : index
      %c0_48 = arith.constant 0 : index
      %45 = vector.load %arg8[%c0_47, %c0_48] : memref<32x1xf32, #tpu.memory_space<vmem>>, vector<32x1xf32>
      tpu.vector_store %arg8[%c0_47, %c0_48], %44 {strides = array<i32>} : memref<32x1xf32, #tpu.memory_space<vmem>>, vector<32x1xf32>,
      %c0_49 = arith.constant 0 : index
      %c0_50 = arith.constant 0 : index
      %46 = vector.load %arg9[%c0_49, %c0_50] : memref<32x1xf32, #tpu.memory_space<vmem>>, vector<32x1xf32>
      %47 = arith.mulf %36, %36 : vector<32x32xf32>
      %cst_51 = arith.constant dense<0.000000e+00> : vector<32xf32>
      %48 = vector.multi_reduction <add>, %47, %cst_51 [1] : vector<32x32xf32> to vector<32xf32>
      %49 = vector.shape_cast %48 : vector<32xf32> to vector<32x1xf32>
      %50 = arith.addf %46, %49 : vector<32x1xf32>
      %c0_52 = arith.constant 0 : index
      %c0_53 = arith.constant 0 : index
      %51 = vector.load %arg9[%c0_52, %c0_53] : memref<32x1xf32, #tpu.memory_space<vmem>>, vector<32x1xf32>
      tpu.vector_store %arg9[%c0_52, %c0_53], %50 {strides = array<i32>} : memref<32x1xf32, #tpu.memory_space<vmem>>, vector<32x1xf32>,
    } else {
    }
    %c1_i32 = arith.constant 1 : i32
    %8 = arith.cmpi eq, %arg0, %c1_i32 : i32
    %c0_i32_4 = arith.constant 0 : i32
    %9 = arith.cmpi eq, %arg1, %c0_i32_4 : i32
    %10 = arith.andi %8, %9 : i1
    %11 = arith.extui %10 : i1 to i32
    %c0_i32_5 = arith.constant 0 : i32
    %12 = arith.cmpi ne, %11, %c0_i32_5 : i32
    scf.if %12 {
      %c0 = arith.constant 0 : index
      %c0_8 = arith.constant 0 : index
      %16 = vector.load %arg8[%c0, %c0_8] : memref<32x1xf32, #tpu.memory_space<vmem>>, vector<32x1xf32>
      %cst = arith.constant 3.125000e-02 : f32
      %17 = vector.broadcast %cst : f32 to vector<32x1xf32>
      %18 = arith.mulf %16, %17 : vector<32x1xf32>
      %c0_9 = arith.constant 0 : index
      %c0_10 = arith.constant 0 : index
      %19 = vector.load %arg9[%c0_9, %c0_10] : memref<32x1xf32, #tpu.memory_space<vmem>>, vector<32x1xf32>
      %cst_11 = arith.constant 3.125000e-02 : f32
      %20 = vector.broadcast %cst_11 : f32 to vector<32x1xf32>
      %21 = arith.mulf %19, %20 : vector<32x1xf32>
      %22 = arith.mulf %18, %18 : vector<32x1xf32>
      %23 = arith.subf %21, %22 : vector<32x1xf32>
      %cst_12 = arith.constant 0.000000e+00 : f32
      %24 = vector.broadcast %cst_12 : f32 to vector<32x1xf32>
      %25 = arith.maximumf %23, %24 : vector<32x1xf32>
      %c0_13 = arith.constant 0 : index
      %c0_14 = arith.constant 0 : index
      %26 = vector.load %arg4[%c0_13, %c0_14] : memref<32x1xf32, #tpu.memory_space<vmem>>, vector<32x1xf32>
      %cst_15 = arith.constant 9.99999974E-6 : f32
      %27 = vector.broadcast %cst_15 : f32 to vector<32x1xf32>
      %28 = arith.addf %25, %27 : vector<32x1xf32>
      %29 = math.rsqrt %28 : vector<32x1xf32>
      %30 = arith.mulf %26, %29 : vector<32x1xf32>
      %c0_16 = arith.constant 0 : index
      %c0_17 = arith.constant 0 : index
      %31 = vector.load %arg10[%c0_16, %c0_17] : memref<32x1xf32, #tpu.memory_space<vmem>>, vector<32x1xf32>
      tpu.vector_store %arg10[%c0_16, %c0_17], %30 {strides = array<i32>} : memref<32x1xf32, #tpu.memory_space<vmem>>, vector<32x1xf32>,
      %c0_18 = arith.constant 0 : index
      %c0_19 = arith.constant 0 : index
      %32 = vector.load %arg5[%c0_18, %c0_19] : memref<32x1xf32, #tpu.memory_space<vmem>>, vector<32x1xf32>
      %33 = arith.mulf %18, %30 : vector<32x1xf32>
      %34 = arith.subf %32, %33 : vector<32x1xf32>
      %c0_20 = arith.constant 0 : index
      %c0_21 = arith.constant 0 : index
      %35 = vector.load %arg11[%c0_20, %c0_21] : memref<32x1xf32, #tpu.memory_space<vmem>>, vector<32x1xf32>
      tpu.vector_store %arg11[%c0_20, %c0_21], %34 {strides = array<i32>} : memref<32x1xf32, #tpu.memory_space<vmem>>, vector<32x1xf32>,
    } else {
    }
    %c1_i32_6 = arith.constant 1 : i32
    %13 = arith.cmpi eq, %arg0, %c1_i32_6 : i32
    %14 = arith.extui %13 : i1 to i32
    %c0_i32_7 = arith.constant 0 : i32
    %15 = arith.cmpi ne, %14, %c0_i32_7 : i32
    scf.if %15 {
      %16 = arith.index_cast %arg1 : i32 to index
      %c0 = arith.constant 0 : index
      %c0_8 = arith.constant 0 : index
      %17 = vector.load %arg6[%16, %c0, %c0_8] : memref<1x32x32xf32, #tpu.memory_space<vmem>>, vector<1x32x32xf32>
      %18 = vector.shape_cast %17 : vector<1x32x32xf32> to vector<32x32xf32>
      %c0_9 = arith.constant 0 : index
      %c0_10 = arith.constant 0 : index
      %19 = vector.load %arg10[%c0_9, %c0_10] : memref<32x1xf32, #tpu.memory_space<vmem>>, vector<32x1xf32>
      %20 = vector.broadcast %19 : vector<32x1xf32> to vector<32x32xf32>
      %21 = arith.mulf %18, %20 : vector<32x32xf32>
      %c0_11 = arith.constant 0 : index
      %c0_12 = arith.constant 0 : index
      %22 = vector.load %arg11[%c0_11, %c0_12] : memref<32x1xf32, #tpu.memory_space<vmem>>, vector<32x1xf32>
      %23 = vector.broadcast %22 : vector<32x1xf32> to vector<32x32xf32>
      %24 = arith.addf %21, %23 : vector<32x32xf32>
      %cst = arith.constant 2.000000e-01 : f32
      %25 = vector.broadcast %cst : f32 to vector<32x32xf32>
      %26 = arith.mulf %25, %24 : vector<32x32xf32>
      %27 = arith.maximumf %24, %26 : vector<32x32xf32>
      %28 = arith.index_cast %arg1 : i32 to index
      %c0_13 = arith.constant 0 : index
      %c0_14 = arith.constant 0 : index
      %29 = vector.load %arg6[%28, %c0_13, %c0_14] : memref<1x32x32xf32, #tpu.memory_space<vmem>>, vector<1x32x32xf32>
      %30 = vector.shape_cast %29 : vector<1x32x32xf32> to vector<32x32xf32>
      %31 = vector.shape_cast %27 : vector<32x32xf32> to vector<1x32x32xf32>
      tpu.vector_store %arg6[%28, %c0_13, %c0_14], %31 {strides = array<i32>} : memref<1x32x32xf32, #tpu.memory_space<vmem>>, vector<1x32x32xf32>,
    } else {
    }
    return
  }
  func.func @transform_0(%arg0: i32, %arg1: i32) -> (i32, i32, i32, i32) {
    %c1_i32 = arith.constant 1 : i32
    %0 = arith.subi %c1_i32, %arg0 : i32
    %1 = arith.muli %arg1, %0 : i32
    %c0_i32 = arith.constant 0 : i32
    %c0_i32_0 = arith.constant 0 : i32
    %c0_i32_1 = arith.constant 0 : i32
    %c0_i32_2 = arith.constant 0 : i32
    return %c0_i32, %c0_i32_0, %1, %c0_i32_1 : i32, i32, i32, i32
  }
  func.func @transform_1(%arg0: i32, %arg1: i32) -> (i32, i32) {
    %c0_i32 = arith.constant 0 : i32
    %c0_i32_0 = arith.constant 0 : i32
    %c0_i32_1 = arith.constant 0 : i32
    return %c0_i32, %c0_i32_0 : i32, i32
  }
  func.func @transform_2(%arg0: i32, %arg1: i32) -> (i32, i32) {
    %c0_i32 = arith.constant 0 : i32
    %c0_i32_0 = arith.constant 0 : i32
    %c0_i32_1 = arith.constant 0 : i32
    return %c0_i32, %c0_i32_0 : i32, i32
  }
  func.func @transform_3(%arg0: i32, %arg1: i32) -> (i32, i32) {
    %c0_i32 = arith.constant 0 : i32
    %c0_i32_0 = arith.constant 0 : i32
    %c0_i32_1 = arith.constant 0 : i32
    return %c0_i32, %c0_i32_0 : i32, i32
  }
  func.func @transform_4(%arg0: i32, %arg1: i32) -> (i32, i32, i32) {
    %c0_i32 = arith.constant 0 : i32
    %c0_i32_0 = arith.constant 0 : i32
    %c0_i32_1 = arith.constant 0 : i32
    %c0_i32_2 = arith.constant 0 : i32
    return %c0_i32, %c0_i32_0, %c0_i32_1 : i32, i32, i32
  }
}

</mosaic_0001>

<bundles_post_ra>
// kernel: conv_norm_relu_1d.1
= control target key start
LH: loop header
LB: loop body
LE: loop exit
PB: predicated region body
PF: predicated region fallthrough
CT: control target
= control target key end

     0   :  { %s1189_s15 = smov 0   ;;  %s1191_s16 = smov 0   ;;  %s1356_s0 = inlined_call_operand.vmem [shape: bf16[1,4,2,18], index: 0, kind: input, shape index: {}]   ;;  %s1357_s1 = inlined_call_operand.vmem [shape: bf16[32,12], index: 1, kind: input, shape index: {}]   ;;  %s1358_s2 = inlined_call_operand.vmem [shape: f32[32,1], index: 2, kind: input, shape index: {}]   ;;  %s1359_s3 = inlined_call_operand.vmem [shape: f32[32,1], index: 3, kind: input, shape index: {}]   ;;  %s1360_s4 = inlined_call_operand.vmem [shape: f32[1,32,32], index: 4, kind: output, shape index: {}]  }
   0x1   :  { %s1193_s17 = smov 0  }
   0x2 LB: > { %s26_s18 = sadd.s32 1, %s1150_s16  ;;  %p1039_p0 = scmp.ge.s32.totalorder %s1154_s17, 1  ;;  %s1154_s17 = sphi %s1193_s17, %s14_s17   ;;  %s1150_s16 = sphi %s1191_s16, %s1362_s16   ;;  %s1146_s15 = sphi %s1189_s15, %s1361_s15  }
   0x3   : > { %p28_p1 = scmp.ge.s32.totalorder %s26_s18, 2  ;;  %p175_p2 = scmp.lt.s32.totalorder %s1154_s17, 3 }
   0x5   : > { %s1364_s18 = smov (%p28_p1, %s26_s18), 0  ;;  %p176_p3 = pnand %p1039_p0, %p175_p2 }
   0x6   : > { %p204_p4 = scmp.eq.s32.totalorder (!%p176_p3), %s1146_s15, 0 }
   0x7   : > { %179 = sbr.rel (%p176_p3) target bundleno = 729 (0x2d9), region = 36 }
   0xe   : > { %209 = sbr.rel (!%p204_p4) target bundleno = 21 (0x15), region = 40  ;;  %vm210_vm0 = vcmask (%p204_p4), 7168   ;;  %v1156_v0 = vmov (%p204_p4), 0.0  }
   0xf   : > { %211 = vst.msk [vmem:[#allocation3] sm:$0xff] (%p204_p4), %vm210_vm0, %v1156_v0  ;;  %212 = vst.msk [vmem:[#allocation3 + $0x8] sm:$0xff] (%p204_p4), %vm210_vm0, %v1156_v0 }
  0x10   : > { %213 = vst.msk [vmem:[#allocation3 + $0x10] sm:$0xff] (%p204_p4), %vm210_vm0, %v1156_v0  ;;  %214 = vst.msk [vmem:[#allocation3 + $0x18] sm:$0xff] (%p204_p4), %vm210_vm0, %v1156_v0 }
  0x11   : > { %215 = vst.msk [vmem:[#allocation4] sm:$0xff] (%p204_p4), %vm210_vm0, %v1156_v0  ;;  %216 = vst.msk [vmem:[#allocation4 + $0x8] sm:$0xff] (%p204_p4), %vm210_vm0, %v1156_v0 }
  0x12   : > { %217 = vst.msk [vmem:[#allocation4 + $0x10] sm:$0xff] (%p204_p4), %vm210_vm0, %v1156_v0  ;;  %218 = vst.msk [vmem:[#allocation4 + $0x18] sm:$0xff] (%p204_p4), %vm210_vm0, %v1156_v0 }
  0x15 PF: > { %p1041_p5 = scmp.ne.s32.totalorder %s1146_s15, 0 }
  0x16   : > { %v240_v1 = vlaneseq (!%p1041_p5)  ;;  %v1157_v2 = vmov (!%p1041_p5), 1935823168   ;;  %vm291_vm1 = vcmask (!%p1041_p5), 1041409   ;;  %vm294_vm2 = vcmask (!%p1041_p5), 1042434   ;;  %s1158_s9 = smov (!%p1041_p5), 126   ;;  %s1159_s10 = smov (!%p1041_p5), 16  }
  0x17   : > { %221 = sbr.rel (%p1041_p5) target bundleno = 546 (0x222), region = 44  ;;  %v238_v3 = vunpack.c.l.s4 (!%p1041_p5), %v1157_v2  ;;  %v1054_v5 = vld.sshfl [vmem:[%s1356_s0] sm:$0x1 pattern:$0x73625140] (!%p1041_p5)  ;;  %vm297_vm3 = vcmask (!%p1041_p5), 1043459  }
  0x18   : > { %v241_v4 = vshrl.u32 (!%p1041_p5), %v240_v1, 7  ;;  %v1055_v6 = vld.sshfl [vmem:[%s1356_s0 + $0x1] sm:$0x1 pattern:$0x73625140] (!%p1041_p5)  ;;  %vm456_vm4 = vcmask (!%p1041_p5), 1045509  }
  0x19   : > { %v239_v7 = vunpack.c.0.s8 (!%p1041_p5), %v238_v3  ;;  %v1056_v8 = vld.sshfl [vmem:[%s1356_s0 + $0x2] sm:$0x1 pattern:$0x73625140] (!%p1041_p5)  ;;  %vm459_vm5 = vcmask (!%p1041_p5), 1046534   ;;  %vm462_vm6 = vcmask (!%p1041_p5), 1047559  }
  0x1a   : > { %v1057_v9 = vld.sshfl [vmem:[%s1356_s0 + $0x3] sm:$0x1 pattern:$0x73625140] (!%p1041_p5)  ;;  %vm301_vm7 = vcmask (!%p1041_p5), 123904   ;;  %s1160_s11 = smov (!%p1041_p5), 127  }
  0x1b   : > { %v242_v10 = vsub.s32 (!%p1041_p5), %v239_v7, %v241_v4  ;;  %v1115_v11 = vld [vmem:[%s1356_s0] ss:$0 sps:$4 sm:$0x11] (!%p1041_p5)   ;;  %v1116_v12 = vld [vmem:[%s1356_s0 + $0x1] ss:$0 sps:$4 sm:$0x11] (!%p1041_p5)  }
  0x1c   : > { %v1117_v17 = vld [vmem:[%s1356_s0 + $0x2] ss:$0 sps:$4 sm:$0x11] (!%p1041_p5)   ;;  %v1118_v18 = vld [vmem:[%s1356_s0 + $0x3] ss:$0 sps:$4 sm:$0x11] (!%p1041_p5)  }
  0x1d   : > { %v572_v13 = vrot.slane (!%p1041_p5), %v1054_v5, %v242_v10  ;;  %v586_v14 = vrot.slane (!%p1041_p5), %v1055_v6, %v242_v10  ;;  %v600_v15 = vrot.slane (!%p1041_p5), %v1056_v8, %v242_v10  ;;  %v614_v16 = vrot.slane (!%p1041_p5), %v1057_v9, %v242_v10  ;;  %v1120_v0 = vld [vmem:[%s1357_s1] sm:$0xff] (!%p1041_p5)   ;;  %s1161_s14 = smov (!%p1041_p5), 15   ;;  %s1162_s19 = smov (!%p1041_p5), 14   ;;  %v1121_v8 = vld [vmem:[%s1357_s1 + $0x8] sm:$0xff] (!%p1041_p5)  }
  0x1e   : > { %v398_v19 = vrot.slane %v1115_v11, %v242_v10  ;;  %v413_v20 = vrot.slane %v1116_v12, %v242_v10  ;;  %v428_v27 = vrot.slane %v1117_v17, %v242_v10  ;;  %v443_v28 = vrot.slane %v1118_v18, %v242_v10 }
  0x1f   : > { %v615_v21 = vunpack.c.l.b16 %v572_v13  ;;  %v616_v22 = vunpack.c.l.b16 %v586_v14  ;;  %v617_v23 = vunpack.c.l.b16 %v600_v15  ;;  %v618_v24 = vunpack.c.l.b16 %v614_v16 }
  0x20   : > { %v405_v25 = vrot.slane %v398_v19, %v242_v10  ;;  %v420_v26 = vrot.slane %v413_v20, %v242_v10  ;;  %v435_v35 = vrot.slane %v428_v27, %v242_v10  ;;  %v450_v36 = vrot.slane %v443_v28, %v242_v10 }
  0x21   : > { %v619_v29 = vrot.slane %v616_v22, 7  ;;  %v621_v30 = vrot.slane %v617_v23, 6  ;;  %v623_v31 = vrot.slane %v618_v24, 5  ;;  %v371_v32 = vrot.slane %v615_v21, 1 }
  0x22   : > { %v373_v33 = vrot.slane %v617_v23, 7  ;;  %v375_v34 = vrot.slane %v618_v24, 6  ;;  %v451_v39 = vunpack.c.l.b16 %v405_v25  ;;  %v452_v40 = vunpack.c.l.b16 %v420_v26  ;;  %v799_v25 = vld [vmem:[#allocation3 + $0x10] sm:$0xff]  ;;  %v797_v26 = vld [vmem:[#allocation3] sm:$0xff] }
  0x23   : > { %v620_v37 = vsel %vm291_vm1, %v619_v29, %v615_v21  ;;  %v372_v38 = vsel %vm291_vm1, %v616_v22, %v371_v32  ;;  %v453_v43 = vunpack.c.l.b16 %v435_v35  ;;  %v454_v44 = vunpack.c.l.b16 %v450_v36  ;;  %v800_v32 = vld [vmem:[#allocation3 + $0x18] sm:$0xff] }
  0x24   : > { %v622_v41 = vsel %vm294_vm2, %v621_v30, %v620_v37  ;;  %v374_v42 = vsel %vm294_vm2, %v373_v33, %v372_v38  ;;  %v455_v47 = vrot.slane %v452_v40, 7  ;;  %v538_v48 = vrot.slane %v615_v21, 5  ;;  %v822_v37 = vld [vmem:[#allocation4] sm:$0xff]  ;;  %v823_v38 = vld [vmem:[#allocation4 + $0x8] sm:$0xff] }
  0x25   : > { %v624_v45 = vsel %vm297_vm3, %v623_v31, %v622_v41  ;;  %v376_v46 = vsel %vm297_vm3, %v375_v34, %v374_v42  ;;  %v458_v51 = vrot.slane %v453_v43, 6  ;;  %v461_v52 = vrot.slane %v454_v44, 5  ;;  %v798_v31 = vld [vmem:[#allocation3 + $0x8] sm:$0xff]  ;;  %v824_v43 = vld [vmem:[#allocation4 + $0x10] sm:$0xff]  ;;  %v825_v44 = vld [vmem:[#allocation4 + $0x18] sm:$0xff] }
  0x26   : > { %v625_v49 = vpack.c.b16 %v624_v45, %v624_v45  ;;  %v377_v50 = vpack.c.b16 %v376_v46, %v376_v46  ;;  %v457_v53 = vsel %vm456_vm4, %v455_v47, %v451_v39  ;;  %v539_v54 = vrot.slane %v616_v22, 4 }
  0x27   : > { %v541_v55 = vrot.slane %v617_v23, 3  ;;  %v543_v56 = vrot.slane %v618_v24, 2  ;;  %v460_v57 = vsel %vm459_vm5, %v458_v51, %v457_v53  ;;  %vm730_vm8 = vcmask 97280  }
  0x28   : > { %626 = vrot.lane.b32.xlu0 %v625_v49, %s1158_s9  ;;  %378 = vrot.lane.b32.xlu1 %v377_v50, %s1159_s10  ;;  %302 = vst.msk [vmem:[#allocation2] sm:$0x3] %vm301_vm7, %v625_v49  ;;  %v463_v58 = vsel %vm462_vm6, %v461_v52, %v460_v57  ;;  %v540_v59 = vsel %vm456_vm4, %v539_v54, %v538_v48  ;;  %vm381_vm9 = vcmask 255104   ;;  %vm468_vm10 = vcmask 125954  }
  0x29   : > { %v464_v60 = vpack.c.b16 %v463_v58, %v463_v58  ;;  %v542_v61 = vsel %vm459_vm5, %v541_v55, %v540_v59  ;;  %1078 = vmatprep.mubr.msk.bf16.mxu0 %vm730_vm8, %v1120_v0  ;;  %vm549_vm11 = vcmask 257154   ;;  %vm737_vm12 = vcmask 1045504  }
  0x2a   : > { %v544_v62 = vsel %vm462_vm6, %v543_v56, %v542_v61  ;;  %vm792_vm13 = vcmask 261120   ;;  %vm817_vm14 = vcmask 7168  }
  0x2b   : > { %v545_v63 = vpack.c.b16 %v544_v62, %v544_v62 }
  0x2c   : > { %465 = vrot.lane.b32.xlu0 %v464_v60, %s1160_s11 }
  0x2d   : > { %546 = vrot.lane.b32.xlu1 %v545_v63, %s1161_s14 }
  0x30   : > { %705 = vrot.lane.b32.xlu0 %v377_v50, %s1162_s19 }
  0x9a   : > { %v627_v1 = vpop.permute.xlu0 %626  ;;  %v379_v2 = vpop.permute.xlu1 %378 }
  0x9b   : > { %629 = vst.msk [vmem:[#allocation2 + $0x4] sm:$0x3] %vm301_vm7, %v627_v1 }
  0x9c   : > { %382 = vst.msk [vmem:[#allocation2] sm:$0x3] %vm381_vm9, %v379_v2 }
  0x9e   : > { %v466_v3 = vpop.permute.xlu0 %465 }
  0x9f   : > { %469 = vst.msk [vmem:[#allocation2] sm:$0xc] %vm468_vm10, %v466_v3  ;;  %v547_v4 = vpop.permute.xlu1 %546 }
  0xa0   : > { %550 = vst.msk [vmem:[#allocation2] sm:$0xc] %vm549_vm11, %v547_v4 }
  0xa2   : > { %v706_v5 = vpop.permute.xlu0 %705 }
  0xa3   : > { %708 = vst.msk [vmem:[#allocation2 + $0x4] sm:$0x3] %vm381_vm9, %v706_v5 }
  0xaa   : > { %v1119_v6 = vld [vmem:[#allocation2] sm:$0x3f]  }
  0xab   : > { %1082 = vmatprep.subr.msk.bf16.mxu0 %vm737_vm12, %v1119_v6  ;;  %v739_v7 = vsel %vm737_vm12, %v1119_v6, 0 }
  0xac   : > { %1077 = vmatpush3.bf16.msra.mxu0 %v739_v7 }
  0xaf   : > { %1079 = vmatmul.mubr.msk.bf16.vlgmr.msra.gmra.mrb[0].mxu0 %vm730_vm8, %v1121_v8 }
 0x182   : > { %v1080_v9 = vpop.f32.mrb[0].mxu0 }
 0x183   : > { %795 = vst.msk [vmem:[%s1360_s4 + $0x10] sm:$0xff] %vm792_vm13, %v1080_v9  ;;  %v775_v10 = vpop.f32.mrb[1].mxu0  ;;  %v807_v11 = vsel %vm792_vm13, %v1080_v9, 0.0  ;;  %v828_v20 = vmul.f32 %v1080_v9, %v1080_v9 }
 0x184   : > { %793 = vst.msk [vmem:[%s1360_s4] sm:$0xff] %vm792_vm13, %v775_v10  ;;  %808 = vadd.xlane.f32.xlu0 %v807_v11  ;;  %v1081_v12 = vpop.f32.mrb[2].mxu0  ;;  %v801_v13 = vsel %vm792_vm13, %v775_v10, 0.0  ;;  %v826_v16 = vmul.f32 %v775_v10, %v775_v10 }
 0x185   : > { %796 = vst.msk [vmem:[%s1360_s4 + $0x18] sm:$0xff] %vm792_vm13, %v1081_v12  ;;  %802 = vadd.xlane.f32.xlu1 %v801_v13  ;;  %v778_v14 = vpop.f32.mrb[3].mxu0  ;;  %v810_v18 = vsel %vm792_vm13, %v1081_v12, 0.0  ;;  %v829_v22 = vmul.f32 %v1081_v12, %v1081_v12  ;;  %v836_v23 = vsel %vm792_vm13, %v828_v20, 0.0 }
 0x186   : > { %794 = vst.msk [vmem:[%s1360_s4 + $0x8] sm:$0xff] %vm792_vm13, %v778_v14  ;;  %v804_v15 = vsel %vm792_vm13, %v778_v14, 0.0  ;;  %v827_v17 = vmul.f32 %v778_v14, %v778_v14  ;;  %v830_v19 = vsel %vm792_vm13, %v826_v16, 0.0 }
 0x187   : > { %v839_v24 = vsel %vm792_vm13, %v829_v22, 0.0 }
 0x188   : > { %805 = vadd.xlane.f32.xlu0 %v804_v15  ;;  %v833_v21 = vsel %vm792_vm13, %v827_v17, 0.0 }
 0x189   : > { %811 = vadd.xlane.f32.xlu1 %v810_v18 }
 0x18c   : > { %831 = vadd.xlane.f32.xlu0 %v830_v19 }
 0x18d   : > { %834 = vadd.xlane.f32.xlu1 %v833_v21 }
 0x190   : > { %837 = vadd.xlane.f32.xlu0 %v836_v23 }
 0x191   : > { %840 = vadd.xlane.f32.xlu1 %v839_v24 }
 0x211   : > { %v809_v27 = vpop.xlane.xlu0 %808 }
 0x212   : > { %v815_v28 = vadd.f32 %v809_v27, %v799_v25  ;;  %v803_v29 = vpop.xlane.xlu1 %802 }
 0x213   : > { %v813_v30 = vadd.f32 %v803_v29, %v797_v26 }
 0x214   : > { %820 = vst.msk [vmem:[#allocation3 + $0x10] sm:$0xff] %vm817_vm14, %v815_v28 }
 0x215   : > { %818 = vst.msk [vmem:[#allocation3] sm:$0xff] %vm817_vm14, %v813_v30  ;;  %v806_v33 = vpop.xlane.xlu0 %805 }
 0x216   : > { %v814_v34 = vadd.f32 %v806_v33, %v798_v31  ;;  %v812_v35 = vpop.xlane.xlu1 %811 }
 0x217   : > { %v816_v36 = vadd.f32 %v812_v35, %v800_v32 }
 0x218   : > { %819 = vst.msk [vmem:[#allocation3 + $0x8] sm:$0xff] %vm817_vm14, %v814_v34 }
 0x219   : > { %821 = vst.msk [vmem:[#allocation3 + $0x18] sm:$0xff] %vm817_vm14, %v816_v36  ;;  %v832_v39 = vpop.xlane.xlu0 %831 }
 0x21a   : > { %v842_v40 = vadd.f32 %v832_v39, %v822_v37  ;;  %v835_v41 = vpop.xlane.xlu1 %834 }
 0x21b   : > { %v843_v42 = vadd.f32 %v835_v41, %v823_v38 }
 0x21c   : > { %846 = vst.msk [vmem:[#allocation4] sm:$0xff] %vm817_vm14, %v842_v40 }
 0x21d   : > { %847 = vst.msk [vmem:[#allocation4 + $0x8] sm:$0xff] %vm817_vm14, %v843_v42  ;;  %v838_v45 = vpop.xlane.xlu0 %837 }
 0x21e   : > { %v844_v46 = vadd.f32 %v838_v45, %v824_v43  ;;  %v841_v47 = vpop.xlane.xlu1 %840 }
 0x21f   : > { %v845_v48 = vadd.f32 %v841_v47, %v825_v44 }
 0x220   : > { %848 = vst.msk [vmem:[#allocation4 + $0x10] sm:$0xff] %vm817_vm14, %v844_v46 }
 0x221   : > { %849 = vst.msk [vmem:[#allocation4 + $0x18] sm:$0xff] %vm817_vm14, %v845_v48 }
 0x222 PF: > { %p850_p6 = scmp.eq.s32.totalorder %s1146_s15, 1 }
 0x223   : > { %v855_v49 = vld [vmem:[#allocation3] sm:$0xff] (%p850_p6)  ;;  %v856_v53 = vld [vmem:[#allocation3 + $0x8] sm:$0xff] (%p850_p6)  ;;  %v857_v57 = vld [vmem:[#allocation3 + $0x10] sm:$0xff] (%p850_p6)  ;;  %vm899_vm15 = vcmask (%p850_p6), 7168  }
 0x224   : > { %854 = sbr.rel (!%p850_p6) target bundleno = 579 (0x243), region = 48  ;;  %v863_v50 = vld [vmem:[#allocation4] sm:$0xff] (%p850_p6)  ;;  %v859_v51 = vmul.f32 (%p850_p6), 0.03125, %v855_v49  ;;  %v864_v54 = vld [vmem:[#allocation4 + $0x8] sm:$0xff] (%p850_p6)  ;;  %v860_v55 = vmul.f32 (%p850_p6), 0.03125, %v856_v53  ;;  %v861_v60 = vmul.f32 (%p850_p6), 0.03125, %v857_v57 }
 0x225   : > { %v867_v52 = vmul.f32 (%p850_p6), 0.03125, %v863_v50  ;;  %v868_v56 = vmul.f32 (%p850_p6), 0.03125, %v864_v54  ;;  %v858_v62 = vld [vmem:[#allocation3 + $0x18] sm:$0xff] (%p850_p6)  ;;  %v884_v18 = vld [vmem:[%s1358_s2 + $0x8] sm:$0xff] (%p850_p6)  ;;  %v885_v20 = vld [vmem:[%s1358_s2 + $0x10] sm:$0xff] (%p850_p6) }
 0x226   : > { %v871_v59 = vmul.f32 (%p850_p6), %v859_v51, %v859_v51  ;;  %v872_v0 = vmul.f32 (%p850_p6), %v860_v55, %v860_v55  ;;  %v862_v1 = vmul.f32 (%p850_p6), 0.03125, %v858_v62  ;;  %v873_v4 = vmul.f32 (%p850_p6), %v861_v60, %v861_v60  ;;  %v883_v17 = vld [vmem:[%s1358_s2] sm:$0xff] (%p850_p6)  ;;  %v886_v23 = vld [vmem:[%s1358_s2 + $0x18] sm:$0xff] (%p850_p6)  ;;  %v905_v30 = vld [vmem:[%s1359_s3 + $0x8] sm:$0xff] (%p850_p6) }
 0x227   : > { %v865_v58 = vld [vmem:[#allocation4 + $0x10] sm:$0xff] (%p850_p6)  ;;  %v904_v26 = vld [vmem:[%s1359_s3] sm:$0xff] (%p850_p6)  ;;  %v906_v33 = vld [vmem:[%s1359_s3 + $0x10] sm:$0xff] (%p850_p6) }
 0x228   : > { %v869_v61 = vmul.f32 (%p850_p6), 0.03125, %v865_v58  ;;  %v866_v63 = vld [vmem:[#allocation4 + $0x18] sm:$0xff] (%p850_p6)  ;;  %v875_v3 = vsub.f32 (%p850_p6), %v867_v52, %v871_v59  ;;  %v876_v5 = vsub.f32 (%p850_p6), %v868_v56, %v872_v0  ;;  %v874_v6 = vmul.f32 (%p850_p6), %v862_v1, %v862_v1  ;;  %v907_v36 = vld [vmem:[%s1359_s3 + $0x18] sm:$0xff] (%p850_p6) }
 0x229   : > { %v870_v2 = vmul.f32 (%p850_p6), 0.03125, %v866_v63 }
 0x22a   : > { %v879_v7 = vmax.f32 (%p850_p6), %v875_v3, 0.0  ;;  %v877_v8 = vsub.f32 (%p850_p6), %v869_v61, %v873_v4  ;;  %v880_v9 = vmax.f32 (%p850_p6), %v876_v5, 0.0 }
 0x22b   : > { %v878_v10 = vsub.f32 %v870_v2, %v874_v6 }
 0x22c   : > { %v887_v11 = vadd.f32 1e-05, %v879_v7  ;;  %v881_v12 = vmax.f32 %v877_v8, 0.0  ;;  %v888_v13 = vadd.f32 1e-05, %v880_v9 }
 0x22d   : > { %v882_v14 = vmax.f32 %v878_v10, 0.0 }
 0x22e   : > { %1122 = vrsqrt.f32 %v887_v11  ;;  %v889_v15 = vadd.f32 1e-05, %v881_v12 }
 0x22f   : > { %1124 = vrsqrt.f32 %v888_v13  ;;  %v890_v16 = vadd.f32 1e-05, %v882_v14 }
 0x230   : > { %1126 = vrsqrt.f32 %v889_v15 }
 0x231   : > { %1128 = vrsqrt.f32 %v890_v16 }
 0x238   : > { %v1123_v19 = vpop.eup %1122 }
 0x239   : > { %v1125_v21 = vpop.eup %1124  ;;  %v895_v22 = vmul.f32 %v1123_v19, %v883_v17 }
 0x23a   : > { %v1127_v24 = vpop.eup %1126  ;;  %v896_v25 = vmul.f32 %v1125_v21, %v884_v18 }
 0x23b   : > { %v1129_v27 = vpop.eup %1128  ;;  %900 = vst.msk [vmem:[#allocation5] sm:$0xff] %vm899_vm15, %v895_v22  ;;  %v897_v28 = vmul.f32 %v1127_v24, %v885_v20  ;;  %v908_v29 = vmul.f32 %v895_v22, %v859_v51 }
 0x23c   : > { %901 = vst.msk [vmem:[#allocation5 + $0x8] sm:$0xff] %vm899_vm15, %v896_v25  ;;  %v898_v31 = vmul.f32 %v1129_v27, %v886_v23  ;;  %v909_v32 = vmul.f32 %v896_v25, %v860_v55 }
 0x23d   : > { %902 = vst.msk [vmem:[#allocation5 + $0x10] sm:$0xff] %vm899_vm15, %v897_v28  ;;  %v912_v34 = vsub.f32 %v904_v26, %v908_v29  ;;  %v910_v35 = vmul.f32 %v897_v28, %v861_v60 }
 0x23e   : > { %903 = vst.msk [vmem:[#allocation5 + $0x18] sm:$0xff] %vm899_vm15, %v898_v31  ;;  %v913_v37 = vsub.f32 %v905_v30, %v909_v32  ;;  %v911_v38 = vmul.f32 %v898_v31, %v862_v1 }
 0x23f   : > { %916 = vst.msk [vmem:[#allocation6] sm:$0xff] %vm899_vm15, %v912_v34  ;;  %v914_v39 = vsub.f32 %v906_v33, %v910_v35 }
 0x240   : > { %917 = vst.msk [vmem:[#allocation6 + $0x8] sm:$0xff] %vm899_vm15, %v913_v37  ;;  %v915_v40 = vsub.f32 %v907_v36, %v911_v38 }
 0x241   : > { %918 = vst.msk [vmem:[#allocation6 + $0x10] sm:$0xff] %vm899_vm15, %v914_v39 }
 0x242   : > { %919 = vst.msk [vmem:[#allocation6 + $0x18] sm:$0xff] %vm899_vm15, %v915_v40 }
 0x243 PF: > { %p1068_p7 = scmp.ne.s32.totalorder %s1146_s15, 1 }
 0x244   : > { %v931_v41 = vld [vmem:[#allocation5 + $0x10] sm:$0xff] (!%p1068_p7)  ;;  %v929_v42 = vld [vmem:[#allocation5] sm:$0xff] (!%p1068_p7)  ;;  %v1163_v43 = vmov (!%p1068_p7), 0   ;;  %v930_v45 = vld [vmem:[#allocation5 + $0x8] sm:$0xff] (!%p1068_p7)  ;;  %vm993_vm0 = vcmask (!%p1068_p7), 261120  }
 0x245   : > { %922 = sbr.rel (%p1068_p7) target bundleno = 729 (0x2d9), region = 52  ;;  %1131 = vset.pattern.permute.xlu1 (!%p1068_p7), %v1163_v43  ;;  %1130 = vset.pattern.permute.xlu0 (!%p1068_p7), %v1163_v43  ;;  %v932_v44 = vld [vmem:[#allocation5 + $0x18] sm:$0xff] (!%p1068_p7)  ;;  %v926_v55 = vld [vmem:[%s1360_s4 + $0x8] sm:$0xff] (!%p1068_p7)  ;;  %v927_v58 = vld [vmem:[%s1360_s4 + $0x10] sm:$0xff] (!%p1068_p7) }
 0x246   : > { %945 = vperm.xlu1 (!%p1068_p7), %1131, %v931_v41   ;;  %935 = vperm.xlu0 (!%p1068_p7), %1130, %v929_v42   ;;  %v957_v47 = vld [vmem:[#allocation6] sm:$0xff] (!%p1068_p7)  ;;  %v925_v52 = vld [vmem:[%s1360_s4] sm:$0xff] (!%p1068_p7)  ;;  %v928_v59 = vld [vmem:[%s1360_s4 + $0x18] sm:$0xff] (!%p1068_p7) }
 0x247   : > { %v958_v46 = vld [vmem:[#allocation6 + $0x8] sm:$0xff] (!%p1068_p7) }
 0x248   : > { %v959_v49 = vld [vmem:[#allocation6 + $0x10] sm:$0xff] (!%p1068_p7) }
 0x249   : > { %v960_v48 = vld [vmem:[#allocation6 + $0x18] sm:$0xff] (!%p1068_p7) }
 0x24a   : > { %950 = vperm.xlu1 (!%p1068_p7), %1131, %v932_v44   ;;  %940 = vperm.xlu0 (!%p1068_p7), %1130, %v930_v45  }
 0x24e   : > { %968 = vperm.xlu1 %1131, %v958_v46   ;;  %963 = vperm.xlu0 %1130, %v957_v47  }
 0x252   : > { %978 = vperm.xlu1 %1131, %v960_v48   ;;  %973 = vperm.xlu0 %1130, %v959_v49  }
 0x2c5   : > { %v946_v50 = vpop.permute.xlu1 %945  ;;  %v936_v51 = vpop.permute.xlu0 %935 }
 0x2c6   : > { %v953_v56 = vmul.f32 %v936_v51, %v925_v52  ;;  %v955_v0 = vmul.f32 %v946_v50, %v927_v58 }
 0x2c9   : > { %v951_v53 = vpop.permute.xlu1 %950  ;;  %v941_v54 = vpop.permute.xlu0 %940 }
 0x2ca   : > { %v954_v57 = vmul.f32 %v941_v54, %v926_v55  ;;  %v956_v1 = vmul.f32 %v951_v53, %v928_v59 }
 0x2cd   : > { %v969_v60 = vpop.permute.xlu1 %968  ;;  %v964_v61 = vpop.permute.xlu0 %963 }
 0x2ce   : > { %v982_v62 = vadd.f32 %v969_v60, %v954_v57  ;;  %v981_v63 = vadd.f32 %v964_v61, %v953_v56 }
 0x2d0   : > { %v986_v2 = vmul.f32 0.2, %v982_v62  ;;  %v985_v3 = vmul.f32 0.2, %v981_v63 }
 0x2d1   : > { %v979_v4 = vpop.permute.xlu1 %978  ;;  %v974_v5 = vpop.permute.xlu0 %973 }
 0x2d2   : > { %v990_v6 = vmax.f32 %v982_v62, %v986_v2  ;;  %v989_v7 = vmax.f32 %v981_v63, %v985_v3  ;;  %v984_v8 = vadd.f32 %v979_v4, %v956_v1  ;;  %v983_v9 = vadd.f32 %v974_v5, %v955_v0 }
 0x2d4   : > { %995 = vst.msk [vmem:[%s1360_s4 + $0x8] sm:$0xff] %vm993_vm0, %v990_v6  ;;  %994 = vst.msk [vmem:[%s1360_s4] sm:$0xff] %vm993_vm0, %v989_v7  ;;  %v988_v10 = vmul.f32 0.2, %v984_v8  ;;  %v987_v11 = vmul.f32 0.2, %v983_v9 }
 0x2d6   : > { %v992_v12 = vmax.f32 %v984_v8, %v988_v10  ;;  %v991_v13 = vmax.f32 %v983_v9, %v987_v11 }
 0x2d8   : > { %997 = vst.msk [vmem:[%s1360_s4 + $0x18] sm:$0xff] %vm993_vm0, %v992_v12  ;;  %996 = vst.msk [vmem:[%s1360_s4 + $0x10] sm:$0xff] %vm993_vm0, %v991_v13 }
 0x2d9 PF: > { %s14_s17 = sadd.s32 1, %s1154_s17   ;;  %s1361_s15 = smov %s1150_s16 }
 0x2da   : > { %p11_p8 = scmp.ge.s32.totalorder %s14_s17, 4   ;;  %s1362_s16 = smov %s1364_s18 }
 0x2dc   :  { %13 = sbr.rel (!%p11_p8) target bundleno = 2 (0x2), region = 80 }

</bundles_post_ra>
